<compile_context>
chip_gen: v7x
topology: tpu7x:2x2x1
jax: 0.10.0
libtpu: 0.0.40
codegen_flags: <defaults>
</compile_context>

<pallas_src>
import functools

import jax
import jax.numpy as jnp
from jax.experimental import pallas as pl
from jax.experimental.pallas import tpu as pltpu

_LANES = 128
_SUBLANES = 8
_TARGET_BLOCK_BYTES = 4 * 1024 * 1024   # per input buffer (double-buffered)
_CHUNK_ROWS = 1024                      # compute chunk inside a block
_N_SPLIT = 2                            # leading "parallel" grid axis (v7x: 2 TCs)
_VMEM_LIMIT_BYTES = 32 * 1024 * 1024    # 2x4MiB bufs + ~3MiB f32 temps, w/ headroom


def _loss_elems(x, target, use_least_squares):
    """Per-element loss against the constant label, computed in f32."""
    x = x.astype(jnp.float32)
    if use_least_squares:
        d = x - target
        return d * d
    # BCEWithLogitsLoss vs constant label, numerically stable softplus form:
    #   y=1 -> softplus(-x),  y=0 -> softplus(x)
    z = -x if target == 1.0 else x
    return jnp.maximum(z, 0.0) + jnp.log1p(jnp.exp(-jnp.abs(z)))


def _gan_loss_kernel(x_ref, out_ref, *, use_least_squares, target, n_valid,
                     block_rows, tiles_per_split, ragged_possible,
                     dummy_possible):
    s = pl.program_id(0)            # parallel split (TensorCore shard on v7x)
    t = pl.program_id(1)            # reduction steps within the split

    @pl.when(t == 0)
    def _():
        out_ref[...] = jnp.zeros_like(out_ref)

    block_elems = block_rows * _LANES
    tile_idx = s * tiles_per_split + t        # unclamped logical tile index
    start = tile_idx * block_elems            # first logical element of block
    is_full = start + block_elems <= n_valid
    has_any = start < n_valid                 # False only on dummy (clamped) steps

    def fold(v, rows):
        # Fold (rows, 128) into the resident (8, 128) accumulator block.
        return jnp.sum(v.reshape(rows // _SUBLANES, _SUBLANES, _LANES), axis=0)

    # Evaluate the elementwise loss in 1024-row chunks so f32 temporaries stay
    # small even though the DMA block is 4 MiB.
    chunks = [(c0, min(_CHUNK_ROWS, block_rows - c0))
              for c0 in range(0, block_rows, _CHUNK_ROWS)]

    def add_full():
        for c0, cr in chunks:
            x = x_ref[pl.ds(c0, cr), :]
            out_ref[...] += fold(_loss_elems(x, target, use_least_squares), cr)

    def add_ragged():
        # Ragged / overhanging / padded block: mask invalid elements.
        for c0, cr in chunks:
            x = x_ref[pl.ds(c0, cr), :]
            e = _loss_elems(x, target, use_least_squares)
            idx = (start + c0 * _LANES
                   + jax.lax.broadcasted_iota(jnp.int32, (cr, _LANES), 0) * _LANES
                   + jax.lax.broadcasted_iota(jnp.int32, (cr, _LANES), 1))
            out_ref[...] += fold(jnp.where(idx < n_valid, e, 0.0), cr)

    # Only emit the branches that can actually trigger for this configuration.
    if ragged_possible:
        pl.when(is_full)(add_full)
        pl.when(jnp.logical_and(has_any, jnp.logical_not(is_full)))(add_ragged)
    elif dummy_possible:
        pl.when(has_any)(add_full)
    else:
        add_full()

    @pl.when(t == tiles_per_split - 1)
    def _():
        # In-kernel final reduce: fill the output block with this split's total
        # so the wrapper only reads one scalar per split.
        acc = out_ref[...]
        tot = jnp.sum(jnp.sum(acc, axis=1, keepdims=True), axis=0, keepdims=True)
        out_ref[...] = jnp.broadcast_to(tot, (_SUBLANES, _LANES))


def gan_loss(input_, is_tgt_real, use_least_squares=False):
    """Pallas GANLoss forward. `is_tgt_real`/`use_least_squares` must be static bools."""
    is_tgt_real = bool(is_tgt_real)          # assert static (traced -> error)
    use_least_squares = bool(use_least_squares)
    target = 1.0 if is_tgt_real else 0.0

    n = int(input_.size)
    if n == 0:
        return jnp.float32(jnp.nan)          # torch mean over empty tensor -> nan

    # Flatten to a lane-dense slab in the input's NATIVE dtype (no pre-cast:
    # bf16 stays bf16 on the wire; the kernel upcasts per chunk in VMEM).
    flat = jnp.reshape(input_, (-1,))
    itemsize = jnp.dtype(input_.dtype).itemsize
    sub = max(_SUBLANES, 32 // itemsize)     # sublane pack: f32:8 bf16:16 int8:32
    align = sub * _LANES                     # one packed vreg tile of elements

    tail_sum = None
    if n % align == 0:
        x_main, n_valid = flat, n            # zero-copy fast path
    else:
        n_main = (n // align) * align
        if n_main == 0:
            # Tiny tensor (< one aligned tile): pad; copy cost is negligible here.
            x_main, n_valid = jnp.pad(flat, (0, align - n)), n
        else:
            # Ragged: stream the aligned prefix through Pallas, fold the small
            # (< align-element) tail in with plain XLA instead of a full-array pad.
            x_main, n_valid = flat[:n_main], n_main
            tail_sum = jnp.sum(
                _loss_elems(flat[n_main:], target, use_least_squares))

    rows = int(x_main.size) // _LANES        # always a multiple of `sub`
    x2 = jnp.reshape(x_main, (rows, _LANES))

    # ~4 MiB per input buffer regardless of dtype; multiple of 32 rows covers
    # every packed-dtype sublane requirement.
    max_rows = max(sub, (_TARGET_BLOCK_BYTES // (_LANES * itemsize)) // 32 * 32)
    block_rows = min(max_rows, rows)
    block_elems = block_rows * _LANES
    tiles = -(-rows // block_rows)
    n_split = _N_SPLIT if tiles >= _N_SPLIT else 1
    tiles_per_split = -(-tiles // n_split)

    kernel = functools.partial(
        _gan_loss_kernel,
        use_least_squares=use_least_squares,
        target=target,
        n_valid=n_valid,
        block_rows=block_rows,
        tiles_per_split=tiles_per_split,
        ragged_possible=(n_valid % block_elems) != 0,
        dummy_possible=(n_split * tiles_per_split) > tiles,
    )

    def x_index_map(s, t):
        # Clamp so dummy grid points past the last tile re-map to the final
        # tile; their compute is skipped in-kernel (has_any is False there).
        return (jnp.minimum(s * tiles_per_split + t, tiles - 1), 0)

    partials = pl.pallas_call(
        kernel,
        out_shape=jax.ShapeDtypeStruct((n_split * _SUBLANES, _LANES),
                                       jnp.float32),
        grid_spec=pltpu.PrefetchScalarGridSpec(
            num_scalar_prefetch=0,
            grid=(n_split, tiles_per_split),
            in_specs=[pl.BlockSpec((block_rows, _LANES), x_index_map)],
            out_specs=pl.BlockSpec((_SUBLANES, _LANES), lambda s, t: (s, 0)),
        ),
        compiler_params=pltpu.CompilerParams(
            dimension_semantics=("parallel", "arbitrary"),
            vmem_limit_bytes=_VMEM_LIMIT_BYTES),
    )(x2)

    # Each split's (8,128) block is filled with that split's total; combine
    # <= 2 scalars (+ optional XLA tail) and apply 1/N in one tiny fused op.
    total = jnp.sum(partials[0::_SUBLANES, 0])
    if tail_sum is not None:
        total = total + tail_sum
    return total * jnp.float32(1.0 / n)


def _gan_loss_ref(input_, is_tgt_real, use_least_squares=False):
    x = input_.astype(jnp.float32)
    y = 1.0 if is_tgt_real else 0.0
    if use_least_squares:
        return jnp.mean((x - y) ** 2)
    return jnp.mean(jnp.maximum(x, 0.0) - x * y + jnp.log1p(jnp.exp(-jnp.abs(x))))


if __name__ == "__main__":
    key = jax.random.PRNGKey(0)
    cases = [
        ((2, 4, 16, 16), jnp.float32),      # main case: aligned, single block
        ((2, 3, 9, 7), jnp.float32),        # tiny ragged -> pad + in-kernel mask
        ((1, 3, 419, 421), jnp.float32),    # aligned prefix + XLA tail + 2-way split + overhang block
        ((3, 16, 256, 128), jnp.float32),   # multi-tile, dual-split, one dummy grid step
        ((2, 4, 16, 16), jnp.bfloat16),     # bf16 end-to-end (16-sublane tiling)
    ]

    ok = True
    for i, (shape, dtype) in enumerate(cases):
        x = jax.random.normal(jax.random.fold_in(key, i), shape,
                              dtype=jnp.float32).astype(dtype)
        for use_ls in (False, True):
            for is_real in (True, False):
                got = jax.block_until_ready(gan_loss(x, is_real, use_ls))
                want = jax.block_until_ready(_gan_loss_ref(x, is_real, use_ls))
                if not jnp.allclose(got, want, rtol=1e-4, atol=1e-5):
                    ok = False
                    print(f"MISMATCH shape={shape} dtype={jnp.dtype(dtype).name} "
                          f"use_ls={use_ls} is_real={is_real}: {got} vs {want}")

    if ok:
        print("KERNEL_OK")
</pallas_src>

<mosaic_0001>
module attributes {stable_mosaic.version = 11 : i64} {
  func.func @_gan_loss_kernel(%arg0: i32, %arg1: i32, %arg2: memref<16x128xf32, #tpu.memory_space<vmem>>, %arg3: memref<8x128xf32, #tpu.memory_space<vmem>>) attributes {dimension_semantics = [#tpu.dimension_semantics<parallel>, #tpu.dimension_semantics<arbitrary>], iteration_bounds = array<i64: 1, 1>, scalar_prefetch = 0 : i64, scratch_operands = 0 : i64, tpu.core_type = #tpu.core_type<tc>, window_params = [{transform_indices = @transform_0, window_bounds = array<i64: 16, 128>}, {transform_indices = @transform_1, window_bounds = array<i64: 8, 128>}]} {
    %c0_i32 = arith.constant 0 : i32
    %0 = arith.cmpi eq, %arg1, %c0_i32 : i32
    %1 = arith.extui %0 : i1 to i32
    %c0_i32_0 = arith.constant 0 : i32
    %2 = arith.cmpi ne, %1, %c0_i32_0 : i32
    scf.if %2 {
      %cst_11 = arith.constant 0.000000e+00 : f32
      %22 = vector.broadcast %cst_11 : f32 to vector<8x128xf32>
      %c0_12 = arith.constant 0 : index
      %c0_13 = arith.constant 0 : index
      %23 = vector.load %arg3[%c0_12, %c0_13] : memref<8x128xf32, #tpu.memory_space<vmem>>, vector<8x128xf32>
      tpu.vector_store %arg3[%c0_12, %c0_13], %22 {strides = array<i32>} : memref<8x128xf32, #tpu.memory_space<vmem>>, vector<8x128xf32>,
    } else {
    }
    %c0 = arith.constant 0 : index
    %c0_1 = arith.constant 0 : index
    %3 = vector.load %arg2[%c0, %c0_1] : memref<16x128xf32, #tpu.memory_space<vmem>>, vector<16x128xf32>
    %c0_2 = arith.constant 0 : index
    %c0_3 = arith.constant 0 : index
    %4 = vector.load %arg3[%c0_2, %c0_3] : memref<8x128xf32, #tpu.memory_space<vmem>>, vector<8x128xf32>
    %cst = arith.constant 0.000000e+00 : f32
    %5 = vector.broadcast %cst : f32 to vector<16x128xf32>
    %6 = arith.subf %5, %3 : vector<16x128xf32>
    %cst_4 = arith.constant 0.000000e+00 : f32
    %7 = vector.broadcast %cst_4 : f32 to vector<16x128xf32>
    %8 = arith.maximumf %6, %7 : vector<16x128xf32>
    %9 = math.absf %6 : vector<16x128xf32>
    %cst_5 = arith.constant 0.000000e+00 : f32
    %10 = vector.broadcast %cst_5 : f32 to vector<16x128xf32>
    %11 = arith.subf %10, %9 : vector<16x128xf32>
    %12 = math.exp %11 : vector<16x128xf32>
    %13 = math.log1p %12 : vector<16x128xf32>
    %14 = arith.addf %8, %13 : vector<16x128xf32>
    %15 = vector.shape_cast %14 : vector<16x128xf32> to vector<2x8x128xf32>
    %cst_6 = arith.constant dense<0.000000e+00> : vector<8x128xf32>
    %16 = vector.multi_reduction <add>, %15, %cst_6 [0] : vector<2x8x128xf32> to vector<8x128xf32>
    %17 = arith.addf %4, %16 : vector<8x128xf32>
    %c0_7 = arith.constant 0 : index
    %c0_8 = arith.constant 0 : index
    %18 = vector.load %arg3[%c0_7, %c0_8] : memref<8x128xf32, #tpu.memory_space<vmem>>, vector<8x128xf32>
    tpu.vector_store %arg3[%c0_7, %c0_8], %17 {strides = array<i32>} : memref<8x128xf32, #tpu.memory_space<vmem>>, vector<8x128xf32>,
    %c0_i32_9 = arith.constant 0 : i32
    %19 = arith.cmpi eq, %arg1, %c0_i32_9 : i32
    %20 = arith.extui %19 : i1 to i32
    %c0_i32_10 = arith.constant 0 : i32
    %21 = arith.cmpi ne, %20, %c0_i32_10 : i32
    scf.if %21 {
      %c0_11 = arith.constant 0 : index
      %c0_12 = arith.constant 0 : index
      %22 = vector.load %arg3[%c0_11, %c0_12] : memref<8x128xf32, #tpu.memory_space<vmem>>, vector<8x128xf32>
      %cst_13 = arith.constant dense<0.000000e+00> : vector<8xf32>
      %23 = vector.multi_reduction <add>, %22, %cst_13 [1] : vector<8x128xf32> to vector<8xf32>
      %24 = vector.shape_cast %23 : vector<8xf32> to vector<8x1xf32>
      %cst_14 = arith.constant dense<0.000000e+00> : vector<1xf32>
      %25 = vector.multi_reduction <add>, %24, %cst_14 [0] : vector<8x1xf32> to vector<1xf32>
      %26 = vector.shape_cast %25 : vector<1xf32> to vector<1x1xf32>
      %27 = vector.shape_cast %26 : vector<1x1xf32> to vector<1x1xf32>
      %28 = vector.broadcast %27 : vector<1x1xf32> to vector<8x128xf32>
      %c0_15 = arith.constant 0 : index
      %c0_16 = arith.constant 0 : index
      %29 = vector.load %arg3[%c0_15, %c0_16] : memref<8x128xf32, #tpu.memory_space<vmem>>, vector<8x128xf32>
      tpu.vector_store %arg3[%c0_15, %c0_16], %28 {strides = array<i32>} : memref<8x128xf32, #tpu.memory_space<vmem>>, vector<8x128xf32>,
    } else {
    }
    return
  }
  func.func @transform_0(%arg0: i32, %arg1: i32) -> (i32, i32) {
    %c1_i32 = arith.constant 1 : i32
    %0 = arith.muli %arg0, %c1_i32 : i32
    %1 = arith.addi %0, %arg1 : i32
    %c0_i32 = arith.constant 0 : i32
    %2 = arith.minsi %1, %c0_i32 : i32
    %c0_i32_0 = arith.constant 0 : i32
    %c0_i32_1 = arith.constant 0 : i32
    return %2, %c0_i32_0 : i32, i32
  }
  func.func @transform_1(%arg0: i32, %arg1: i32) -> (i32, i32) {
    %c0_i32 = arith.constant 0 : i32
    %c0_i32_0 = arith.constant 0 : i32
    return %arg0, %c0_i32 : i32, i32
  }
}

</mosaic_0001>

<bundles_post_ra>
// kernel: tpu_custom_call.1
= control target key start
LH: loop header
LB: loop body
LE: loop exit
PB: predicated region body
PF: predicated region fallthrough
CT: control target
= control target key end

     0   :  { %6 = vsyncpa [#allocation3], 0  ;;  %s205_s0 = inlined_call_operand.hbm [shape: f32[16,128], index: 0, kind: input, shape index: {}]   ;;  %s206_s1 = inlined_call_operand.hbm [shape: f32[8,128], index: 1, kind: output, shape index: {}]  }
   0x1   :  { %7 = vsyncpa [#allocation4], 0  ;;  %s167_s6 = smov [#allocation2]   ;;  %s119_s10 = scalar_lea.hbm %s205_s0, 256 }
   0x2   :  { %s19_s7 = sshll.u32 %s167_s6, 4  ;;  %p120_p0 = scmp.ne.s32.totalorder %s205_s0, %s119_s10  ;;  %s20_s7 = int_to_ptr.vmem [resolvable:$true] %s19_s7 }
   0x3   :  { %p123_p1 = scmp.lt.u32.totalorder %s119_s10, %s205_s0 }
   0x5   :  { %p125_p2 = pnand %p123_p1, %p120_p0 }
   0x7   :  { %128 = shalt.err (!%p125_p2)
}
   0x8   :  { %s129_s15 = scalar_lea.vmem %s20_s7, 256  ;;  %p134_p4 = scmp.lt.s32.totalorder %s20_s7, %s20_s7 }
   0x9   :  { %p130_p3 = scmp.ne.s32.totalorder %s20_s7, %s129_s15  ;;  %p135_p5 = scmp.lt.s32.totalorder %s129_s15, %s129_s15 }
   0xb   :  { %p136_p6 = por %p135_p5, %p134_p4 }
   0xd   :  { %p137_p7 = pnand %p136_p6, %p130_p3 }
   0xf   :  { %140 = shalt.err (!%p137_p7)
}
  0x10   :  { %s168_s16 = smov 128   ;;  %s169_s17 = smov 8  }
  0x11   :  { %25 = dma.hbm_to_vmem [thread:$0]  %s205_s0, 256, %s20_s7, [#allocation3], %s168_s16, %s168_s16, %s169_s17  }
  0x12   :  { %163 = dma.done.wait [#allocation3], 256  }
  0x13   :  { %164 = vsyncadd [#allocation3], 4294967040  ;;  %v38_v0 = vld [vmem:[#allocation2] sm:$0xff]  ;;  %v39_v1 = vld [vmem:[#allocation2 + $0x8] sm:$0xff]  ;;  %s170_s0 = smov [#allocation5]  }
  0x14   :  { %v41_v2 = vsub.f32 0.0, %v38_v0  ;;  %v42_v3 = vsub.f32 0.0, %v39_v1  ;;  %s95_s20 = sshll.u32 %s170_s0, 4  ;;  %s96_s20 = int_to_ptr.vmem [resolvable:$true] %s95_s20 }
  0x15   :  { %s141_s21 = scalar_lea.vmem %s96_s20, 128  ;;  %p146_p9 = scmp.lt.s32.totalorder %s96_s20, %s96_s20 }
  0x16   :  { %v45_v4 = vand.u32 2147483647, %v41_v2  ;;  %v46_v5 = vand.u32 2147483647, %v42_v3  ;;  %v43_v22 = vmax.f32 %v41_v2, 0.0  ;;  %v44_v25 = vmax.f32 %v42_v3, 0.0  ;;  %p142_p8 = scmp.ne.s32.totalorder %s96_s20, %s141_s21  ;;  %p147_p10 = scmp.lt.s32.totalorder %s141_s21, %s141_s21 }
  0x18   :  { %v47_v6 = vsub.f32 0.0, %v45_v4  ;;  %v48_v7 = vsub.f32 0.0, %v46_v5  ;;  %p148_p11 = por %p147_p10, %p146_p9 }
  0x1a   :  { %v49_v8 = vmul.f32 1.442695, %v47_v6  ;;  %v51_v9 = vmul.f32 1.442695, %v48_v7  ;;  %p149_p12 = pnand %p148_p11, %p142_p8 }
  0x1c   :  { %111 = vpow2.f32 %v49_v8 }
  0x1d   :  { %113 = vpow2.f32 %v51_v9 }
  0x26   :  { %v112_v10 = vpop.eup %111 }
  0x27   :  { %v114_v11 = vpop.eup %113  ;;  %v53_v12 = vadd.f32 1.0, %v112_v10  ;;  %v56_v14 = vmul.f32 -0.5, %v112_v10  ;;  %v59_v17 = vand.u32 2147483647, %v112_v10 }
  0x28   :  { %v62_v13 = vadd.f32 1.0, %v114_v11  ;;  %v65_v15 = vmul.f32 -0.5, %v114_v11  ;;  %v68_v19 = vand.u32 2147483647, %v114_v11 }
  0x29   :  { %115 = vlog2.f32 %v53_v12  ;;  %v57_v16 = vadd.f32 1.0, %v56_v14  ;;  %vm60_vm0 = vcmp.lt.f32.partialorder %v59_v17, 0.0004427343 }
  0x2a   :  { %117 = vlog2.f32 %v62_v13  ;;  %v66_v18 = vadd.f32 1.0, %v65_v15  ;;  %vm69_vm1 = vcmp.lt.f32.partialorder %v68_v19, 0.0004427343 }
  0x2b   :  { %v58_v20 = vmul.f32 %v112_v10, %v57_v16 }
  0x2c   :  { %v67_v23 = vmul.f32 %v114_v11, %v66_v18 }
  0x33   :  { %v116_v21 = vpop.eup %115 }
  0x34   :  { %v118_v24 = vpop.eup %117  ;;  %v55_v26 = vmul.f32 0.6931472, %v116_v21 }
  0x35   :  { %v64_v27 = vmul.f32 0.6931472, %v118_v24 }
  0x36   :  { %v61_v28 = vsel %vm60_vm0, %v58_v20, %v55_v26 }
  0x37   :  { %v70_v29 = vsel %vm69_vm1, %v67_v23, %v64_v27  ;;  %v71_v30 = vadd.f32 %v61_v28, %v43_v22 }
  0x38   :  { %v72_v31 = vadd.f32 %v70_v29, %v44_v25 }
  0x3a   :  { %v73_v32 = vadd.f32 %v72_v31, %v71_v30 }
  0x3c   :  { %80 = vadd.xlane.f32.xlu0 %v73_v32 }
  0xc9   :  { %v81_v33 = vpop.xlane.xlu0 %80 }
  0xca   :  { %v82_v34 = vrot.slane %v81_v33, 4 }
  0xcc   :  { %v83_v35 = vadd.f32 %v82_v34, %v81_v33 }
  0xce   :  { %v84_v36 = vrot.slane %v83_v35, 2 }
  0xd0   :  { %v85_v37 = vadd.f32 %v84_v36, %v83_v35 }
  0xd2   :  { %v86_v38 = vrot.slane %v85_v37, 1 }
  0xd4   :  { %v87_v39 = vadd.f32 %v86_v38, %v85_v37 }
  0xd6   :  { %88 = vst [vmem:[#allocation5] sm:$0xff] %v87_v39 }
  0xd7   :  { %152 = shalt.err (!%p149_p12)
}
  0xd8   :  { %s153_s24 = scalar_lea.hbm %s206_s1, 128 }
  0xd9   :  { %p154_p13 = scmp.ne.s32.totalorder %s206_s1, %s153_s24  ;;  %p157_p0 = scmp.lt.u32.totalorder %s153_s24, %s206_s1 }
  0xdb   :  { %p159_p1 = pnand %p157_p0, %p154_p13 }
  0xdd   :  { %162 = shalt.err (!%p159_p1)
}
  0xde   :  { %98 = dma.vmem_to_hbm [thread:$0]  %s96_s20, 128, %s206_s1, [#allocation4]  }
  0xdf   :  { %165 = dma.done.wait [#allocation4], 128  }
  0xe0   :  { %166 = vsyncadd [#allocation4], 4294967168 }
  0xe1   :  { %102 = vsyncpa [#allocation3], 1 }
  0xe2   :  { %103 = vsyncpa [#allocation4], 1 }

</bundles_post_ra>
